<compile_context>
chip_gen: v6e
topology: v6e:2x2x1
jax: 0.10.0
libtpu: 0.0.40
codegen_flags: <defaults>
</compile_context>

<pallas_src>
import functools

import jax
import jax.numpy as jnp
from jax.experimental import pallas as pl
from jax.experimental.pallas import tpu as pltpu


def _round_up(x: int, m: int) -> int:
    return ((x + m - 1) // m) * m


def _choose_tile_n(n: int, max_rows_by_vmem: int) -> int:
    """Pick a node-tile size: big enough to amortize per-step overhead, small
    enough to fit VMEM and avoid padding waste, and (mildly) preferring >= 2
    grid steps so v7x megacore can use both TensorCores."""
    candidates = [1024, 512, 384, 256, 128, 64, 32, 16, 8]
    feasible = [t for t in candidates if t <= max_rows_by_vmem] or [8]
    best_t, best_cost = None, None
    for t in feasible:
        n_pad = _round_up(n, t)
        steps = n_pad // t
        # dead padded rows + per-step overhead (~0.35us) in "equivalent rows",
        # plus a small penalty for single-step grids (megacore idle).
        cost = (n_pad - n) + 32 * steps + (16 if steps < 2 else 0)
        if best_cost is None or cost < best_cost or (cost == best_cost and t > best_t):
            best_t, best_cost = t, cost
    return best_t


def _decoder_kernel(*refs, num_layers: int, residual_updates: bool):
    """refs = (h_ref, w0, b0, w1, b1, ..., logits_ref, log_probs_ref)."""
    h_ref = refs[0]
    wb = refs[1:1 + 2 * num_layers]
    logits_ref, logp_ref = refs[1 + 2 * num_layers:]

    mm_dtype = wb[0].dtype           # matmul operand dtype (weights' dtype)
    x = h_ref[...].astype(jnp.float32)  # activations live in f32 throughout

    def layer(i, x_f32):
        w = wb[2 * i][...]                       # (in_pad, out_pad), mm_dtype
        b = wb[2 * i + 1][...]                   # (1, out_pad), f32
        return jnp.dot(x_f32.astype(mm_dtype), w,
                       preferred_element_type=jnp.float32) + b

    if residual_updates:
        # h_readout = h_readout + layer(h_readout) for all but the last layer.
        for i in range(num_layers - 1):
            x = x + layer(i, x)
    else:
        # nn.Sequential of Linear layers (no activations in the module).
        for i in range(num_layers - 1):
            x = layer(i, x)
    logits = layer(num_layers - 1, x)

    # log_softmax over the lane-padded vocab axis.  Padded lanes already hold
    # ~finfo(f32).min via the padded final bias, so no mask is needed: they
    # contribute exp(.) == 0 to the sum and are sliced off in the wrapper.
    m = jnp.max(logits, axis=-1, keepdims=True)
    shifted = logits - m
    lse = jnp.log(jnp.sum(jnp.exp(shifted), axis=-1, keepdims=True))
    log_probs = shifted - lse

    logits_ref[...] = logits.astype(logits_ref.dtype)
    logp_ref[...] = log_probs.astype(logp_ref.dtype)


def gcp_mlp_decoder(h, weights, biases, *, residual_updates: bool = False,
                    matmul_dtype=None):
    """Pallas implementation of GCPMLPDecoder.forward.

    Args:
      h: (N, hidden_dim) node features.
      weights: list of (in_dim, out_dim) matrices (transposed nn.Linear.weight).
      biases:  list of (out_dim,) vectors.
      matmul_dtype: optional dtype for MXU operands (e.g. jnp.bfloat16 for
        bf16-in/f32-acc full-rate MXU).  Defaults to h.dtype (exact numerics).
    Returns:
      (logits, log_probs), each (N, vocab_size), dtype of h.
    """
    num_layers = len(weights)
    n, hidden = h.shape
    vocab = weights[-1].shape[1]
    if matmul_dtype is None:
        matmul_dtype = h.dtype

    # ---- lane padding of parameters -----------------------------------------
    hidden_pad = _round_up(hidden, 128)
    vocab_pad = _round_up(vocab, 128)
    neg_fill = float(jnp.finfo(jnp.float32).min)

    padded_w, padded_b = [], []
    for li, (w, b) in enumerate(zip(weights, biases)):
        is_last = li == num_layers - 1
        out_dim = w.shape[1]
        out_pad = vocab_pad if is_last else hidden_pad
        w_p = jnp.pad(w.astype(matmul_dtype),
                      ((0, hidden_pad - w.shape[0]), (0, out_pad - out_dim)))
        # Padded vocab lanes of the FINAL bias get a huge negative value so the
        # in-kernel log_softmax needs no iota/where mask.  Hidden-layer bias
        # padding stays 0 so residual adds keep padded lanes at exactly 0.
        pad_val = neg_fill if is_last else 0.0
        b_p = jnp.pad(b.astype(jnp.float32), ((0, out_pad - out_dim),),
                      constant_values=pad_val)
        padded_w.append(w_p)
        padded_b.append(b_p.reshape(1, out_pad))  # (1, out) lane-aligned row

    # ---- per-generation VMEM budget & tile size ------------------------------
    try:
        vmem_cap = int(pltpu.get_tpu_info().vmem_capacity_bytes)
    except Exception:
        vmem_cap = 64 * 1024 * 1024  # smallest across generations (v7x per-TC)
    vmem_budget = int(vmem_cap * 0.85)  # ~15% headroom for compiler scratch

    itemsize = jnp.dtype(h.dtype).itemsize
    mm_itemsize = jnp.dtype(matmul_dtype).itemsize
    param_bytes = (sum(int(w.size) for w in padded_w) * mm_itemsize
                   + sum(int(b.size) for b in padded_b) * 4)          # 1 buffer each
    per_row_bytes = (2 * hidden_pad * itemsize                        # h: 2 buffers
                     + 2 * 2 * vocab_pad * itemsize                   # 2 outputs x 2 buffers
                     + 4 * (hidden_pad + 3 * vocab_pad))              # f32 x + epilogue temps
    avail = vmem_budget - param_bytes - (2 << 20)
    max_rows = max(8, (avail // per_row_bytes) // 8 * 8) if avail > 0 else 8

    tile_n = _choose_tile_n(n, max_rows)
    n_pad = _round_up(n, tile_n)
    h_p = jnp.pad(h, ((0, n_pad - n), (0, hidden_pad - hidden)))

    # ---- cost estimate & VMEM limit ------------------------------------------
    flops = 2 * n_pad * sum(int(w.shape[0]) * int(w.shape[1]) for w in padded_w)
    io_bytes = (n_pad * hidden_pad + 2 * n_pad * vocab_pad) * itemsize
    cost = pl.CostEstimate(flops=flops,
                           transcendentals=n_pad * (vocab_pad + 1),
                           bytes_accessed=param_bytes + io_bytes)

    needed = param_bytes + tile_n * per_row_bytes + (2 << 20)
    vmem_limit = int(min(vmem_budget, max(int(needed * 1.25), 32 << 20)))

    # ---- specs / call ---------------------------------------------------------
    kernel = functools.partial(_decoder_kernel, num_layers=num_layers,
                               residual_updates=residual_updates)
    operands = [h_p]
    for w_p, b_p in zip(padded_w, padded_b):
        operands += [w_p, b_p]

    out_shape = (jax.ShapeDtypeStruct((n_pad, vocab_pad), h.dtype),
                 jax.ShapeDtypeStruct((n_pad, vocab_pad), h.dtype))
    out_specs = (pl.BlockSpec((tile_n, vocab_pad), lambda i: (i, 0)),
                 pl.BlockSpec((tile_n, vocab_pad), lambda i: (i, 0)))

    def build(param_pipeline_mode):
        in_specs = [pl.BlockSpec((tile_n, hidden_pad), lambda i: (i, 0))]
        for w_p, b_p in zip(padded_w, padded_b):
            if param_pipeline_mode is None:
                in_specs.append(pl.BlockSpec(w_p.shape, lambda i: (0, 0)))
                in_specs.append(pl.BlockSpec(b_p.shape, lambda i: (0, 0)))
            else:
                in_specs.append(pl.BlockSpec(w_p.shape, lambda i: (0, 0),
                                             pipeline_mode=param_pipeline_mode))
                in_specs.append(pl.BlockSpec(b_p.shape, lambda i: (0, 0),
                                             pipeline_mode=param_pipeline_mode))
        return pl.pallas_call(
            kernel,
            out_shape=out_shape,
            grid=(n_pad // tile_n,),
            in_specs=in_specs,
            out_specs=out_specs,
            compiler_params=pltpu.CompilerParams(
                dimension_semantics=("parallel",),
                vmem_limit_bytes=vmem_limit,
            ),
            cost_estimate=cost,
        )

    try:
        # Single-buffer the VMEM-resident parameters (constant index_map).
        logits_p, logp_p = build(pl.Buffered(1))(*operands)
    except Exception:
        # Fallback for jax versions where Buffered(1) is rejected by the
        # top-level TPU pipeliner; default double-buffering is still correct.
        logits_p, logp_p = build(None)(*operands)

    return logits_p[:n, :vocab], logp_p[:n, :vocab]


def _reference(h, weights, biases, residual_updates):
    """Pure-JAX reference mirroring the PyTorch module."""
    x = h.astype(jnp.float32)
    if residual_updates:
        for w, b in zip(weights[:-1], biases[:-1]):
            x = x + (x @ w + b)
        logits = x @ weights[-1] + biases[-1]
    else:
        for w, b in zip(weights, biases):
            x = x @ w + b
        logits = x
    log_probs = jax.nn.log_softmax(logits, axis=-1)
    return logits, log_probs


def _init_params(key, hidden_dim, vocab_size, num_layers):
    """Deterministic Linear-layer parameters (Kaiming-uniform-ish init)."""
    dims = [(hidden_dim, hidden_dim)] * (num_layers - 1) + [(hidden_dim, vocab_size)]
    weights, biases = [], []
    for (d_in, d_out) in dims:
        key, kw, kb = jax.random.split(key, 3)
        bound = 1.0 / jnp.sqrt(d_in)
        # stored as (in, out) == torch_weight.T
        weights.append(
            jax.random.uniform(kw, (d_in, d_out), jnp.float32, -bound, bound)
        )
        biases.append(
            jax.random.uniform(kb, (d_out,), jnp.float32, -bound, bound)
        )
    return weights, biases


if __name__ == "__main__":
    key = jax.random.PRNGKey(0)

    num_nodes = 8      # batch_num_nodes
    hidden_dim = 32
    vocab_size = 20

    key, kh = jax.random.split(key)
    h = jax.random.normal(kh, (num_nodes, hidden_dim), jnp.float32)

    ok = True
    # Exercise both module configurations:
    #   (num_layers=1, residual_updates=False)  -- module defaults
    #   (num_layers=2, residual_updates=True)   -- residual_forward path
    for num_layers, residual in [(1, False), (2, True)]:
        weights, biases = _init_params(key, hidden_dim, vocab_size, num_layers)

        logits, log_probs = gcp_mlp_decoder(
            h, weights, biases, residual_updates=residual
        )
        jax.block_until_ready((logits, log_probs))

        ref_logits, ref_logp = _reference(h, weights, biases, residual)
        ok &= bool(jnp.allclose(logits, ref_logits, atol=1e-4, rtol=1e-4))
        ok &= bool(jnp.allclose(log_probs, ref_logp, atol=1e-4, rtol=1e-4))

    if ok:
        print("KERNEL_OK")
</pallas_src>

<mosaic_0001>
module attributes {stable_mosaic.version = 11 : i64} {
  func.func @_decoder_kernel(%arg0: i32, %arg1: memref<8x128xf32, #tpu.memory_space<vmem>>, %arg2: memref<128x128xf32, #tpu.memory_space<vmem>>, %arg3: memref<1x128xf32, #tpu.memory_space<vmem>>, %arg4: memref<8x128xf32, #tpu.memory_space<vmem>>, %arg5: memref<8x128xf32, #tpu.memory_space<vmem>>) attributes {dimension_semantics = [#tpu.dimension_semantics<parallel>], iteration_bounds = array<i64: 1>, scalar_prefetch = 0 : i64, scratch_operands = 0 : i64, tpu.core_type = #tpu.core_type<tc>, window_params = [{transform_indices = @transform_0, window_bounds = array<i64: 8, 128>}, {pipeline_mode = #tpu.pipeline_mode<synchronous>, transform_indices = @transform_1, window_bounds = array<i64: 128, 128>}, {pipeline_mode = #tpu.pipeline_mode<synchronous>, transform_indices = @transform_2, window_bounds = array<i64: 1, 128>}, {transform_indices = @transform_3, window_bounds = array<i64: 8, 128>}, {transform_indices = @transform_4, window_bounds = array<i64: 8, 128>}]} {
    %c0 = arith.constant 0 : index
    %c0_0 = arith.constant 0 : index
    %0 = vector.load %arg1[%c0, %c0_0] : memref<8x128xf32, #tpu.memory_space<vmem>>, vector<8x128xf32>
    %c0_1 = arith.constant 0 : index
    %c0_2 = arith.constant 0 : index
    %1 = vector.load %arg2[%c0_1, %c0_2] : memref<128x128xf32, #tpu.memory_space<vmem>>, vector<128x128xf32>
    %c0_3 = arith.constant 0 : index
    %c0_4 = arith.constant 0 : index
    %2 = vector.load %arg3[%c0_3, %c0_4] : memref<1x128xf32, #tpu.memory_space<vmem>>, vector<1x128xf32>
    %cst = arith.constant dense<0.000000e+00> : vector<8x128xf32>
    %3 = tpu.matmul %0, %1, %cst {dimension_numbers = #tpu.dot_dimension_numbers<[1], [0], [0], [1], [0, 0, 1, 1], [], []>} : vector<8x128xf32>, vector<128x128xf32>, vector<8x128xf32> -> vector<8x128xf32>
    %4 = vector.broadcast %2 : vector<1x128xf32> to vector<8x128xf32>
    %5 = arith.addf %3, %4 : vector<8x128xf32>
    %cst_5 = arith.constant dense<0xFF800000> : vector<8xf32>
    %6 = vector.multi_reduction <maximumf>, %5, %cst_5 [1] : vector<8x128xf32> to vector<8xf32>
    %7 = vector.shape_cast %6 : vector<8xf32> to vector<8x1xf32>
    %8 = vector.broadcast %7 : vector<8x1xf32> to vector<8x128xf32>
    %9 = arith.subf %5, %8 : vector<8x128xf32>
    %10 = math.exp %9 : vector<8x128xf32>
    %cst_6 = arith.constant dense<0.000000e+00> : vector<8xf32>
    %11 = vector.multi_reduction <add>, %10, %cst_6 [1] : vector<8x128xf32> to vector<8xf32>
    %12 = vector.shape_cast %11 : vector<8xf32> to vector<8x1xf32>
    %13 = math.log %12 : vector<8x1xf32>
    %14 = vector.broadcast %13 : vector<8x1xf32> to vector<8x128xf32>
    %15 = arith.subf %9, %14 : vector<8x128xf32>
    %c0_7 = arith.constant 0 : index
    %c0_8 = arith.constant 0 : index
    %16 = vector.load %arg4[%c0_7, %c0_8] : memref<8x128xf32, #tpu.memory_space<vmem>>, vector<8x128xf32>
    tpu.vector_store %arg4[%c0_7, %c0_8], %5 {strides = array<i32>} : memref<8x128xf32, #tpu.memory_space<vmem>>, vector<8x128xf32>,
    %c0_9 = arith.constant 0 : index
    %c0_10 = arith.constant 0 : index
    %17 = vector.load %arg5[%c0_9, %c0_10] : memref<8x128xf32, #tpu.memory_space<vmem>>, vector<8x128xf32>
    tpu.vector_store %arg5[%c0_9, %c0_10], %15 {strides = array<i32>} : memref<8x128xf32, #tpu.memory_space<vmem>>, vector<8x128xf32>,
    return
  }
  func.func @transform_0(%arg0: i32) -> (i32, i32) {
    %c0_i32 = arith.constant 0 : i32
    %c0_i32_0 = arith.constant 0 : i32
    return %arg0, %c0_i32 : i32, i32
  }
  func.func @transform_1(%arg0: i32) -> (i32, i32) {
    %c0_i32 = arith.constant 0 : i32
    %c0_i32_0 = arith.constant 0 : i32
    %c0_i32_1 = arith.constant 0 : i32
    return %c0_i32, %c0_i32_0 : i32, i32
  }
  func.func @transform_2(%arg0: i32) -> (i32, i32) {
    %c0_i32 = arith.constant 0 : i32
    %c0_i32_0 = arith.constant 0 : i32
    %c0_i32_1 = arith.constant 0 : i32
    return %c0_i32, %c0_i32_0 : i32, i32
  }
  func.func @transform_3(%arg0: i32) -> (i32, i32) {
    %c0_i32 = arith.constant 0 : i32
    %c0_i32_0 = arith.constant 0 : i32
    return %arg0, %c0_i32 : i32, i32
  }
  func.func @transform_4(%arg0: i32) -> (i32, i32) {
    %c0_i32 = arith.constant 0 : i32
    %c0_i32_0 = arith.constant 0 : i32
    return %arg0, %c0_i32 : i32, i32
  }
}

module attributes {stable_mosaic.version = 11 : i64} {
  func.func @_decoder_kernel(%arg0: i32, %arg1: memref<8x128xf32, #tpu.memory_space<vmem>>, %arg2: memref<128x128xf32, #tpu.memory_space<vmem>>, %arg3: memref<1x128xf32, #tpu.memory_space<vmem>>, %arg4: memref<8x128xf32, #tpu.memory_space<vmem>>, %arg5: memref<8x128xf32, #tpu.memory_space<vmem>>) attributes {dimension_semantics = [#tpu.dimension_semantics<parallel>], iteration_bounds = array<i64: 1>, scalar_prefetch = 0 : i64, scratch_operands = 0 : i64, tpu.core_type = #tpu.core_type<tc>, window_params = [{transform_indices = @transform_0, window_bounds = array<i64: 8, 128>}, {pipeline_mode = #tpu.pipeline_mode<synchronous>, transform_indices = @transform_1, window_bounds = array<i64: 128, 128>}, {pipeline_mode = #tpu.pipeline_mode<synchronous>, transform_indices = @transform_2, window_bounds = array<i64: 1, 128>}, {transform_indices = @transform_3, window_bounds = array<i64: 8, 128>}, {transform_indices = @transform_4, window_bounds = array<i64: 8, 128>}]} {
    %c0 = arith.constant 0 : index
    %c0_0 = arith.constant 0 : index
    %0 = vector.load %arg1[%c0, %c0_0] : memref<8x128xf32, #tpu.memory_space<vmem>>, vector<8x128xf32>
    %c0_1 = arith.constant 0 : index
    %c0_2 = arith.constant 0 : index
    %1 = vector.load %arg2[%c0_1, %c0_2] : memref<128x128xf32, #tpu.memory_space<vmem>>, vector<128x128xf32>
    %c0_3 = arith.constant 0 : index
    %c0_4 = arith.constant 0 : index
    %2 = vector.load %arg3[%c0_3, %c0_4] : memref<1x128xf32, #tpu.memory_space<vmem>>, vector<1x128xf32>
    %cst = arith.constant dense<0.000000e+00> : vector<8x128xf32>
    %3 = tpu.matmul %0, %1, %cst {dimension_numbers = #tpu.dot_dimension_numbers<[1], [0], [0], [1], [0, 0, 1, 1], [], []>} : vector<8x128xf32>, vector<128x128xf32>, vector<8x128xf32> -> vector<8x128xf32>
    %4 = vector.broadcast %2 : vector<1x128xf32> to vector<8x128xf32>
    %5 = arith.addf %3, %4 : vector<8x128xf32>
    %cst_5 = arith.constant dense<0xFF800000> : vector<8xf32>
    %6 = vector.multi_reduction <maximumf>, %5, %cst_5 [1] : vector<8x128xf32> to vector<8xf32>
    %7 = vector.shape_cast %6 : vector<8xf32> to vector<8x1xf32>
    %8 = vector.broadcast %7 : vector<8x1xf32> to vector<8x128xf32>
    %9 = arith.subf %5, %8 : vector<8x128xf32>
    %10 = math.exp %9 : vector<8x128xf32>
    %cst_6 = arith.constant dense<0.000000e+00> : vector<8xf32>
    %11 = vector.multi_reduction <add>, %10, %cst_6 [1] : vector<8x128xf32> to vector<8xf32>
    %12 = vector.shape_cast %11 : vector<8xf32> to vector<8x1xf32>
    %13 = math.log %12 : vector<8x1xf32>
    %14 = vector.broadcast %13 : vector<8x1xf32> to vector<8x128xf32>
    %15 = arith.subf %9, %14 : vector<8x128xf32>
    %c0_7 = arith.constant 0 : index
    %c0_8 = arith.constant 0 : index
    %16 = vector.load %arg4[%c0_7, %c0_8] : memref<8x128xf32, #tpu.memory_space<vmem>>, vector<8x128xf32>
    tpu.vector_store %arg4[%c0_7, %c0_8], %5 {strides = array<i32>} : memref<8x128xf32, #tpu.memory_space<vmem>>, vector<8x128xf32>,
    %c0_9 = arith.constant 0 : index
    %c0_10 = arith.constant 0 : index
    %17 = vector.load %arg5[%c0_9, %c0_10] : memref<8x128xf32, #tpu.memory_space<vmem>>, vector<8x128xf32>
    tpu.vector_store %arg5[%c0_9, %c0_10], %15 {strides = array<i32>} : memref<8x128xf32, #tpu.memory_space<vmem>>, vector<8x128xf32>,
    return
  }
  func.func @transform_0(%arg0: i32) -> (i32, i32) {
    %c0_i32 = arith.constant 0 : i32
    %c0_i32_0 = arith.constant 0 : i32
    return %arg0, %c0_i32 : i32, i32
  }
  func.func @transform_1(%arg0: i32) -> (i32, i32) {
    %c0_i32 = arith.constant 0 : i32
    %c0_i32_0 = arith.constant 0 : i32
    %c0_i32_1 = arith.constant 0 : i32
    return %c0_i32, %c0_i32_0 : i32, i32
  }
  func.func @transform_2(%arg0: i32) -> (i32, i32) {
    %c0_i32 = arith.constant 0 : i32
    %c0_i32_0 = arith.constant 0 : i32
    %c0_i32_1 = arith.constant 0 : i32
    return %c0_i32, %c0_i32_0 : i32, i32
  }
  func.func @transform_3(%arg0: i32) -> (i32, i32) {
    %c0_i32 = arith.constant 0 : i32
    %c0_i32_0 = arith.constant 0 : i32
    return %arg0, %c0_i32 : i32, i32
  }
  func.func @transform_4(%arg0: i32) -> (i32, i32) {
    %c0_i32 = arith.constant 0 : i32
    %c0_i32_0 = arith.constant 0 : i32
    return %arg0, %c0_i32 : i32, i32
  }
}

</mosaic_0001>

<bundles_post_ra>
// kernel: tpu_custom_call.1
= control target key start
LH: loop header
LB: loop body
LE: loop exit
PB: predicated region body
PF: predicated region fallthrough
CT: control target
= control target key end

     0   :  { %10 = vsyncpa [#allocation3], 0  ;;  %s381_s0 = inlined_call_operand.hbm [shape: f32[8,128], index: 0, kind: input, shape index: {}]   ;;  %s382_s1 = inlined_call_operand.hbm [shape: f32[128,128], index: 1, kind: input, shape index: {}]   ;;  %s383_s2 = inlined_call_operand.vmem [shape: f32[1,128], index: 2, kind: input, shape index: {}]   ;;  %s384_s3 = inlined_call_operand.hbm [shape: f32[8,128], index: 3, kind: output, shape index: {0}]   ;;  %s385_s4 = inlined_call_operand.hbm [shape: f32[8,128], index: 4, kind: output, shape index: {1}]  }
   0x1   :  { %11 = vsyncpa [#allocation6], 0 }
   0x2   :  { %12 = vsyncpa [#allocation4], 0 }
   0x3   :  { %13 = vsyncpa [#allocation9], 0  ;;  %s333_s15 = smov [#allocation2]   ;;  %s334_s17 = smov [#allocation5]  }
   0x4   :  { %s20_s16 = sshll.u32 %s333_s15, 4  ;;  %s29_s18 = sshll.u32 %s334_s17, 4  ;;  %s21_s16 = int_to_ptr.vmem [resolvable:$true] %s20_s16  ;;  %s30_s18 = int_to_ptr.vmem [resolvable:$true] %s29_s18 }
   0x5   :  { %s253_s19 = scalar_lea.vmem %s21_s16, 128  ;;  %p258_p1 = scmp.lt.s32.totalorder %s21_s16, %s21_s16 }
   0x6   :  { %p254_p0 = scmp.ne.s32.totalorder %s21_s16, %s253_s19  ;;  %p259_p2 = scmp.lt.s32.totalorder %s253_s19, %s253_s19 }
   0x8   :  { %p260_p3 = por %p259_p2, %p258_p1 }
   0xa   :  { %p261_p4 = pnand %p260_p3, %p254_p0 }
   0xc   :  { %264 = shalt.err (!%p261_p4)
}
   0xd   :  { %23 = dma.hbm_to_vmem [thread:$0]  %s381_s0, 128, %s21_s16, [#allocation3]  }
   0xe   :  { %s273_s22 = scalar_lea.vmem %s30_s18, 2048  ;;  %p278_p6 = scmp.lt.s32.totalorder %s30_s18, %s30_s18 }
   0xf   :  { %p274_p5 = scmp.ne.s32.totalorder %s30_s18, %s273_s22  ;;  %p279_p7 = scmp.lt.s32.totalorder %s273_s22, %s273_s22 }
  0x11   :  { %p280_p8 = por %p279_p7, %p278_p6 }
  0x13   :  { %p281_p9 = pnand %p280_p8, %p274_p5 }
  0x15   :  { %284 = shalt.err (!%p281_p9)
}
  0x16   :  { %s335_s23 = smov 128   ;;  %s336_s24 = smov 8  }
  0x17   :  { %35 = dma.hbm_to_vmem [thread:$0]  %s382_s1, 2048, %s30_s18, [#allocation6], %s335_s23, %s335_s23, %s336_s24  }
  0x18   :  { %325 = dma.done.wait [#allocation3], 128  }
  0x19   :  { %326 = vsyncadd [#allocation3], 4294967168 }
  0x1a   :  { %327 = dma.done.wait [#allocation6], 2048  }
  0x1b   :  { %328 = vsyncadd [#allocation6], 4294965248  ;;  %v337_v0 = vmov 0.0   ;;  %vm338_vm0 = vmmov 0   ;;  %v60_v1 = vld [vmem:[#allocation5 + $0x78] sm:$0xff]  ;;  %v59_v2 = vld [vmem:[#allocation5 + $0x70] sm:$0xff] }
  0x1c   :  { %198 = vmatprep.subr.mxu0 %v337_v0  ;;  %230 = vmatprep.mubr.msk.f32.mxu0 %vm338_vm0, %v337_v0  ;;  %v58_v3 = vld [vmem:[#allocation5 + $0x68] sm:$0xff]  ;;  %v57_v4 = vld [vmem:[#allocation5 + $0x60] sm:$0xff]  ;;  %v56_v5 = vld [vmem:[#allocation5 + $0x58] sm:$0xff]  ;;  %s339_s27 = smov [#allocation7]  }
  0x1d   :  { %199 = vmatpush3.msra.mxu0 %v60_v1  ;;  %v55_v6 = vld [vmem:[#allocation5 + $0x50] sm:$0xff]  ;;  %v54_v7 = vld [vmem:[#allocation5 + $0x48] sm:$0xff]  ;;  %v53_v8 = vld [vmem:[#allocation5 + $0x40] sm:$0xff]  ;;  %s156_s28 = sshll.u32 %s339_s27, 4  ;;  %s157_s28 = int_to_ptr.vmem [resolvable:$true] %s156_s28 }
  0x1e   :  { %200 = vmatprep.subr.mxu0 %v337_v0  ;;  %v52_v9 = vld [vmem:[#allocation5 + $0x38] sm:$0xff]  ;;  %v51_v10 = vld [vmem:[#allocation5 + $0x30] sm:$0xff]  ;;  %v50_v11 = vld [vmem:[#allocation5 + $0x28] sm:$0xff]  ;;  %s285_s29 = scalar_lea.vmem %s157_s28, 128  ;;  %p290_p11 = scmp.lt.s32.totalorder %s157_s28, %s157_s28 }
  0x1f   :  { %201 = vmatpush3.msra.mxu0 %v59_v2  ;;  %v49_v12 = vld [vmem:[#allocation5 + $0x20] sm:$0xff]  ;;  %v48_v13 = vld [vmem:[#allocation5 + $0x18] sm:$0xff]  ;;  %v47_v14 = vld [vmem:[#allocation5 + $0x10] sm:$0xff]  ;;  %p286_p10 = scmp.ne.s32.totalorder %s157_s28, %s285_s29  ;;  %p291_p12 = scmp.lt.s32.totalorder %s285_s29, %s285_s29 }
  0x20   :  { %202 = vmatprep.subr.mxu0 %v337_v0  ;;  %v46_v15 = vld [vmem:[#allocation5 + $0x8] sm:$0xff]  ;;  %v45_v16 = vld [vmem:[#allocation5] sm:$0xff]  ;;  %v44_v17 = vld [vmem:[#allocation2] sm:$0xff] }
  0x21   :  { %203 = vmatpush3.msra.mxu0 %v58_v3  ;;  %v180_v18 = vld [vmem:[%s383_s2] ss:$0 sm:$0xff]  ;;  %p292_p13 = por %p291_p12, %p290_p11 }
  0x22   :  { %204 = vmatprep.subr.mxu0 %v337_v0 }
  0x23   :  { %205 = vmatpush3.msra.mxu0 %v57_v4  ;;  %p293_p0 = pnand %p292_p13, %p286_p10 }
  0x24   :  { %206 = vmatprep.subr.mxu0 %v337_v0 }
  0x25   :  { %207 = vmatpush3.msra.mxu0 %v56_v5 }
  0x26   :  { %208 = vmatprep.subr.mxu0 %v337_v0 }
  0x27   :  { %209 = vmatpush3.msra.mxu0 %v55_v6 }
  0x28   :  { %210 = vmatprep.subr.mxu0 %v337_v0 }
  0x29   :  { %211 = vmatpush3.msra.mxu0 %v54_v7 }
  0x2a   :  { %212 = vmatprep.subr.mxu0 %v337_v0 }
  0x2b   :  { %213 = vmatpush3.msra.mxu0 %v53_v8 }
  0x2c   :  { %214 = vmatprep.subr.mxu0 %v337_v0 }
  0x2d   :  { %215 = vmatpush3.msra.mxu0 %v52_v9 }
  0x2e   :  { %216 = vmatprep.subr.mxu0 %v337_v0 }
  0x2f   :  { %217 = vmatpush3.msra.mxu0 %v51_v10 }
  0x30   :  { %218 = vmatprep.subr.mxu0 %v337_v0 }
  0x31   :  { %219 = vmatpush3.msra.mxu0 %v50_v11 }
  0x32   :  { %220 = vmatprep.subr.mxu0 %v337_v0 }
  0x33   :  { %221 = vmatpush3.msra.mxu0 %v49_v12 }
  0x34   :  { %222 = vmatprep.subr.mxu0 %v337_v0 }
  0x35   :  { %223 = vmatpush3.msra.mxu0 %v48_v13 }
  0x36   :  { %224 = vmatprep.subr.mxu0 %v337_v0 }
  0x37   :  { %225 = vmatpush3.msra.mxu0 %v47_v14 }
  0x38   :  { %226 = vmatprep.subr.mxu0 %v337_v0 }
  0x39   :  { %227 = vmatpush3.msra.mxu0 %v46_v15 }
  0x3a   :  { %228 = vmatprep.subr.mxu0 %v337_v0 }
  0x3b   :  { %229 = vmatpush3.msra.mxu0 %v45_v16 }
  0x3c   :  { %231 = vmatmul.mubr.f32.vlgmr.msra.gmra.mxu0 %v44_v17 }
  0xfc   :  { %v134_v19 = vpop.f32.mrf.mxu0 }
  0xfd   :  { %v135_v20 = vadd.f32 %v180_v18, %v134_v19 }
  0xfe   :  { %v232_v21 = vpop.f32.mrf.mxu0 }
  0xff   :  { %148 = vst [vmem:[#allocation7] sm:$0xff] %v135_v20  ;;  %138 = vmax.xlane.f32.xlu0 %v135_v20 }
 0x188   :  { %v139_v22 = vpop.xlane.xlu0 %138 }
 0x189   :  { %v140_v23 = vsub.f32 %v135_v20, %v139_v22 }
 0x18b   :  { %v141_v24 = vmul.f32 1.442695, %v140_v23 }
 0x18d   :  { %241 = vpow2.f32 %v141_v24 }
 0x19a   :  { %v242_v25 = vpop.eup %241 }
 0x19b   :  { %143 = vadd.xlane.f32.xlu0 %v242_v25 }
 0x19c   :  { %296 = shalt.err (!%p293_p0)
}
 0x19d   :  { %159 = dma.vmem_to_hbm [thread:$0]  %s157_s28, 128, %s384_s3, [#allocation4]  }
 0x19e   :  { %s340_s5 = smov [#allocation8]  }
 0x19f   :  { %s166_s6 = sshll.u32 %s340_s5, 4  ;;  %s167_s6 = int_to_ptr.vmem [resolvable:$true] %s166_s6 }
 0x1a0   :  { %s305_s7 = scalar_lea.vmem %s167_s6, 128  ;;  %p310_p2 = scmp.lt.s32.totalorder %s167_s6, %s167_s6 }
 0x1a1   :  { %p306_p1 = scmp.ne.s32.totalorder %s167_s6, %s305_s7  ;;  %p311_p3 = scmp.lt.s32.totalorder %s305_s7, %s305_s7 }
 0x1a3   :  { %p312_p4 = por %p311_p3, %p310_p2 }
 0x1a5   :  { %p313_p5 = pnand %p312_p4, %p306_p1 }
 0x224   :  { %v144_v26 = vpop.xlane.xlu0 %143 }
 0x225   :  { %243 = vlog2.f32 %v144_v26 }
 0x232   :  { %v244_v27 = vpop.eup %243 }
 0x233   :  { %v146_v28 = vmul.f32 0.6931472, %v244_v27 }
 0x235   :  { %v147_v29 = vsub.f32 %v140_v23, %v146_v28 }
 0x237   :  { %149 = vst [vmem:[#allocation8] sm:$0xff] %v147_v29 }
 0x238   :  { %316 = shalt.err (!%p313_p5)
}
 0x239   :  { %169 = dma.vmem_to_hbm [thread:$0]  %s167_s6, 128, %s385_s4, [#allocation9]  }
 0x23a   :  { %329 = dma.done.wait [#allocation4], 128  }
 0x23b   :  { %330 = vsyncadd [#allocation4], 4294967168 }
 0x23c   :  { %331 = dma.done.wait [#allocation9], 128  }
 0x23d   :  { %332 = vsyncadd [#allocation9], 4294967168 }
 0x23e   :  { %176 = vsyncpa [#allocation3], 1 }
 0x23f   :  { %177 = vsyncpa [#allocation6], 1 }
 0x240   :  { %178 = vsyncpa [#allocation4], 1 }
 0x241   :  { %179 = vsyncpa [#allocation9], 1 }

// kernel: tpu_custom_call.1
= control target key start
LH: loop header
LB: loop body
LE: loop exit
PB: predicated region body
PF: predicated region fallthrough
CT: control target
= control target key end

     0   :  { %10 = vsyncpa [#allocation3], 0  ;;  %s381_s0 = inlined_call_operand.hbm [shape: f32[8,128], index: 0, kind: input, shape index: {}]   ;;  %s382_s1 = inlined_call_operand.hbm [shape: f32[128,128], index: 1, kind: input, shape index: {}]   ;;  %s383_s2 = inlined_call_operand.vmem [shape: f32[1,128], index: 2, kind: input, shape index: {}]   ;;  %s384_s3 = inlined_call_operand.hbm [shape: f32[8,128], index: 3, kind: output, shape index: {0}]   ;;  %s385_s4 = inlined_call_operand.hbm [shape: f32[8,128], index: 4, kind: output, shape index: {1}]  }
   0x1   :  { %11 = vsyncpa [#allocation6], 0 }
   0x2   :  { %12 = vsyncpa [#allocation4], 0 }
   0x3   :  { %13 = vsyncpa [#allocation9], 0  ;;  %s333_s15 = smov [#allocation2]   ;;  %s334_s17 = smov [#allocation5]  }
   0x4   :  { %s20_s16 = sshll.u32 %s333_s15, 4  ;;  %s29_s18 = sshll.u32 %s334_s17, 4  ;;  %s21_s16 = int_to_ptr.vmem [resolvable:$true] %s20_s16  ;;  %s30_s18 = int_to_ptr.vmem [resolvable:$true] %s29_s18 }
   0x5   :  { %s253_s19 = scalar_lea.vmem %s21_s16, 128  ;;  %p258_p1 = scmp.lt.s32.totalorder %s21_s16, %s21_s16 }
   0x6   :  { %p254_p0 = scmp.ne.s32.totalorder %s21_s16, %s253_s19  ;;  %p259_p2 = scmp.lt.s32.totalorder %s253_s19, %s253_s19 }
   0x8   :  { %p260_p3 = por %p259_p2, %p258_p1 }
   0xa   :  { %p261_p4 = pnand %p260_p3, %p254_p0 }
   0xc   :  { %264 = shalt.err (!%p261_p4)
}
   0xd   :  { %23 = dma.hbm_to_vmem [thread:$0]  %s381_s0, 128, %s21_s16, [#allocation3]  }
   0xe   :  { %s273_s22 = scalar_lea.vmem %s30_s18, 2048  ;;  %p278_p6 = scmp.lt.s32.totalorder %s30_s18, %s30_s18 }
   0xf   :  { %p274_p5 = scmp.ne.s32.totalorder %s30_s18, %s273_s22  ;;  %p279_p7 = scmp.lt.s32.totalorder %s273_s22, %s273_s22 }
  0x11   :  { %p280_p8 = por %p279_p7, %p278_p6 }
  0x13   :  { %p281_p9 = pnand %p280_p8, %p274_p5 }
  0x15   :  { %284 = shalt.err (!%p281_p9)
}
  0x16   :  { %s335_s23 = smov 128   ;;  %s336_s24 = smov 8  }
  0x17   :  { %35 = dma.hbm_to_vmem [thread:$0]  %s382_s1, 2048, %s30_s18, [#allocation6], %s335_s23, %s335_s23, %s336_s24  }
  0x18   :  { %325 = dma.done.wait [#allocation3], 128  }
  0x19   :  { %326 = vsyncadd [#allocation3], 4294967168 }
  0x1a   :  { %327 = dma.done.wait [#allocation6], 2048  }
  0x1b   :  { %328 = vsyncadd [#allocation6], 4294965248  ;;  %v337_v0 = vmov 0.0   ;;  %vm338_vm0 = vmmov 0   ;;  %v60_v1 = vld [vmem:[#allocation5 + $0x78] sm:$0xff]  ;;  %v59_v2 = vld [vmem:[#allocation5 + $0x70] sm:$0xff] }
  0x1c   :  { %198 = vmatprep.subr.mxu0 %v337_v0  ;;  %230 = vmatprep.mubr.msk.f32.mxu0 %vm338_vm0, %v337_v0  ;;  %v58_v3 = vld [vmem:[#allocation5 + $0x68] sm:$0xff]  ;;  %v57_v4 = vld [vmem:[#allocation5 + $0x60] sm:$0xff]  ;;  %v56_v5 = vld [vmem:[#allocation5 + $0x58] sm:$0xff]  ;;  %s339_s27 = smov [#allocation7]  }
  0x1d   :  { %199 = vmatpush3.msra.mxu0 %v60_v1  ;;  %v55_v6 = vld [vmem:[#allocation5 + $0x50] sm:$0xff]  ;;  %v54_v7 = vld [vmem:[#allocation5 + $0x48] sm:$0xff]  ;;  %v53_v8 = vld [vmem:[#allocation5 + $0x40] sm:$0xff]  ;;  %s156_s28 = sshll.u32 %s339_s27, 4  ;;  %s157_s28 = int_to_ptr.vmem [resolvable:$true] %s156_s28 }
  0x1e   :  { %200 = vmatprep.subr.mxu0 %v337_v0  ;;  %v52_v9 = vld [vmem:[#allocation5 + $0x38] sm:$0xff]  ;;  %v51_v10 = vld [vmem:[#allocation5 + $0x30] sm:$0xff]  ;;  %v50_v11 = vld [vmem:[#allocation5 + $0x28] sm:$0xff]  ;;  %s285_s29 = scalar_lea.vmem %s157_s28, 128  ;;  %p290_p11 = scmp.lt.s32.totalorder %s157_s28, %s157_s28 }
  0x1f   :  { %201 = vmatpush3.msra.mxu0 %v59_v2  ;;  %v49_v12 = vld [vmem:[#allocation5 + $0x20] sm:$0xff]  ;;  %v48_v13 = vld [vmem:[#allocation5 + $0x18] sm:$0xff]  ;;  %v47_v14 = vld [vmem:[#allocation5 + $0x10] sm:$0xff]  ;;  %p286_p10 = scmp.ne.s32.totalorder %s157_s28, %s285_s29  ;;  %p291_p12 = scmp.lt.s32.totalorder %s285_s29, %s285_s29 }
  0x20   :  { %202 = vmatprep.subr.mxu0 %v337_v0  ;;  %v46_v15 = vld [vmem:[#allocation5 + $0x8] sm:$0xff]  ;;  %v45_v16 = vld [vmem:[#allocation5] sm:$0xff]  ;;  %v44_v17 = vld [vmem:[#allocation2] sm:$0xff] }
  0x21   :  { %203 = vmatpush3.msra.mxu0 %v58_v3  ;;  %v180_v18 = vld [vmem:[%s383_s2] ss:$0 sm:$0xff]  ;;  %p292_p13 = por %p291_p12, %p290_p11 }
  0x22   :  { %204 = vmatprep.subr.mxu0 %v337_v0 }
  0x23   :  { %205 = vmatpush3.msra.mxu0 %v57_v4  ;;  %p293_p0 = pnand %p292_p13, %p286_p10 }
  0x24   :  { %206 = vmatprep.subr.mxu0 %v337_v0 }
  0x25   :  { %207 = vmatpush3.msra.mxu0 %v56_v5 }
  0x26   :  { %208 = vmatprep.subr.mxu0 %v337_v0 }
  0x27   :  { %209 = vmatpush3.msra.mxu0 %v55_v6 }
  0x28   :  { %210 = vmatprep.subr.mxu0 %v337_v0 }
  0x29   :  { %211 = vmatpush3.msra.mxu0 %v54_v7 }
  0x2a   :  { %212 = vmatprep.subr.mxu0 %v337_v0 }
  0x2b   :  { %213 = vmatpush3.msra.mxu0 %v53_v8 }
  0x2c   :  { %214 = vmatprep.subr.mxu0 %v337_v0 }
  0x2d   :  { %215 = vmatpush3.msra.mxu0 %v52_v9 }
  0x2e   :  { %216 = vmatprep.subr.mxu0 %v337_v0 }
  0x2f   :  { %217 = vmatpush3.msra.mxu0 %v51_v10 }
  0x30   :  { %218 = vmatprep.subr.mxu0 %v337_v0 }
  0x31   :  { %219 = vmatpush3.msra.mxu0 %v50_v11 }
  0x32   :  { %220 = vmatprep.subr.mxu0 %v337_v0 }
  0x33   :  { %221 = vmatpush3.msra.mxu0 %v49_v12 }
  0x34   :  { %222 = vmatprep.subr.mxu0 %v337_v0 }
  0x35   :  { %223 = vmatpush3.msra.mxu0 %v48_v13 }
  0x36   :  { %224 = vmatprep.subr.mxu0 %v337_v0 }
  0x37   :  { %225 = vmatpush3.msra.mxu0 %v47_v14 }
  0x38   :  { %226 = vmatprep.subr.mxu0 %v337_v0 }
  0x39   :  { %227 = vmatpush3.msra.mxu0 %v46_v15 }
  0x3a   :  { %228 = vmatprep.subr.mxu0 %v337_v0 }
  0x3b   :  { %229 = vmatpush3.msra.mxu0 %v45_v16 }
  0x3c   :  { %231 = vmatmul.mubr.f32.vlgmr.msra.gmra.mxu0 %v44_v17 }
  0xfc   :  { %v134_v19 = vpop.f32.mrf.mxu0 }
  0xfd   :  { %v135_v20 = vadd.f32 %v180_v18, %v134_v19 }
  0xfe   :  { %v232_v21 = vpop.f32.mrf.mxu0 }
  0xff   :  { %148 = vst [vmem:[#allocation7] sm:$0xff] %v135_v20  ;;  %138 = vmax.xlane.f32.xlu0 %v135_v20 }
 0x188   :  { %v139_v22 = vpop.xlane.xlu0 %138 }
 0x189   :  { %v140_v23 = vsub.f32 %v135_v20, %v139_v22 }
 0x18b   :  { %v141_v24 = vmul.f32 1.442695, %v140_v23 }
 0x18d   :  { %241 = vpow2.f32 %v141_v24 }
 0x19a   :  { %v242_v25 = vpop.eup %241 }
 0x19b   :  { %143 = vadd.xlane.f32.xlu0 %v242_v25 }
 0x19c   :  { %296 = shalt.err (!%p293_p0)
}
 0x19d   :  { %159 = dma.vmem_to_hbm [thread:$0]  %s157_s28, 128, %s384_s3, [#allocation4]  }
 0x19e   :  { %s340_s5 = smov [#allocation8]  }
 0x19f   :  { %s166_s6 = sshll.u32 %s340_s5, 4  ;;  %s167_s6 = int_to_ptr.vmem [resolvable:$true] %s166_s6 }
 0x1a0   :  { %s305_s7 = scalar_lea.vmem %s167_s6, 128  ;;  %p310_p2 = scmp.lt.s32.totalorder %s167_s6, %s167_s6 }
 0x1a1   :  { %p306_p1 = scmp.ne.s32.totalorder %s167_s6, %s305_s7  ;;  %p311_p3 = scmp.lt.s32.totalorder %s305_s7, %s305_s7 }
 0x1a3   :  { %p312_p4 = por %p311_p3, %p310_p2 }
 0x1a5   :  { %p313_p5 = pnand %p312_p4, %p306_p1 }
 0x224   :  { %v144_v26 = vpop.xlane.xlu0 %143 }
 0x225   :  { %243 = vlog2.f32 %v144_v26 }
 0x232   :  { %v244_v27 = vpop.eup %243 }
 0x233   :  { %v146_v28 = vmul.f32 0.6931472, %v244_v27 }
 0x235   :  { %v147_v29 = vsub.f32 %v140_v23, %v146_v28 }
 0x237   :  { %149 = vst [vmem:[#allocation8] sm:$0xff] %v147_v29 }
 0x238   :  { %316 = shalt.err (!%p313_p5)
}
 0x239   :  { %169 = dma.vmem_to_hbm [thread:$0]  %s167_s6, 128, %s385_s4, [#allocation9]  }
 0x23a   :  { %329 = dma.done.wait [#allocation4], 128  }
 0x23b   :  { %330 = vsyncadd [#allocation4], 4294967168 }
 0x23c   :  { %331 = dma.done.wait [#allocation9], 128  }
 0x23d   :  { %332 = vsyncadd [#allocation9], 4294967168 }
 0x23e   :  { %176 = vsyncpa [#allocation3], 1 }
 0x23f   :  { %177 = vsyncpa [#allocation6], 1 }
 0x240   :  { %178 = vsyncpa [#allocation4], 1 }
 0x241   :  { %179 = vsyncpa [#allocation9], 1 }

</bundles_post_ra>
